<compile_context>
chip_gen: v7x
topology: tpu7x:2x2x1
jax: 0.10.0
libtpu: 0.0.40
codegen_flags: <defaults>
</compile_context>

<pallas_src>
import math

import jax
import jax.numpy as jnp
import numpy as np
from jax.experimental import pallas as pl
from jax.experimental.pallas import tpu as pltpu

N_FEATURES = 768
N_BUCKETS = 8


def make_nnue_kernel(T, chunk, sub, n_chunks):
    """T: indices per position; chunk: rows per MXU chunk; sub: rows per vreg sub-block."""
    n_sub = chunk // sub

    def build_multihot(idx_cols, F):
        # idx_cols: (chunk, T) int32 -> (chunk, F) bf16 count matrix.
        # Sub-block iota (sub, F): never materialize a tile-sized temp.
        feat = jax.lax.broadcasted_iota(jnp.int32, (sub, F), 1)
        parts = []
        for s in range(n_sub):
            rows = idx_cols[s * sub:(s + 1) * sub, :]          # (sub, T)
            acc = jnp.zeros((sub, F), jnp.float32)             # vreg-resident accumulator
            for t in range(T):                                 # T small & static -> unrolled
                acc = acc + (feat == rows[:, t:t + 1]).astype(jnp.float32)
            parts.append(acc.astype(jnp.bfloat16))             # one cast + store per sub-block
        return parts[0] if n_sub == 1 else jnp.concatenate(parts, axis=0)

    def kernel(idx_ref, w_ref, b_ref, hws_ref, hwn_ref, hb_ref, out_ref):
        F, L1 = w_ref.shape                                    # (768, L1)

        for c in range(n_chunks):                              # chunks are data-independent
            r0 = c * chunk
            idx_chunk = idx_ref[r0:r0 + chunk, :]              # (chunk, 2T) int32
            stm_cols = idx_chunk[:, :T]
            nstm_cols = idx_chunk[:, T:]

            # EmbeddingBag(mode='sum', padding_idx=768): the padding index never matches
            # feat in [0, 767] so padded slots contribute exactly 0; duplicates are
            # counted; counts <= T are exact in bf16.
            mh_stm = build_multihot(stm_cols, F)               # (chunk, F) bf16
            mh_nstm = build_multihot(nstm_cols, F)             # (chunk, F) bf16

            # (chunk, 768) @ (768, L1) bf16-in / f32-accum MXU matmuls, + bias, clamp.
            emb_s = jnp.dot(mh_stm, w_ref[...], preferred_element_type=jnp.float32)
            emb_n = jnp.dot(mh_nstm, w_ref[...], preferred_element_type=jnp.float32)
            emb_s = jnp.clip(emb_s + b_ref[...], 0.0, 1.0)     # (chunk, L1)
            emb_n = jnp.clip(emb_n + b_ref[...], 0.0, 1.0)

            # 8 Linear(2*L1 -> 1) heads with the stm/nstm concat folded into the weights.
            logits = (jnp.dot(emb_s, hws_ref[...], preferred_element_type=jnp.float32)
                      + jnp.dot(emb_n, hwn_ref[...], preferred_element_type=jnp.float32)
                      + hb_ref[...])                           # (chunk, 8)

            # bucket = clip(floor((cnt-1)/4), 0, 7), gathered via masked reduce.
            cnt = jnp.sum((stm_cols != N_FEATURES).astype(jnp.int32),
                          axis=-1, keepdims=True)              # (chunk, 1)
            bidx = jnp.clip((cnt - 1) >> 2, 0, N_BUCKETS - 1)
            col = jax.lax.broadcasted_iota(jnp.int32, (chunk, N_BUCKETS), 1)
            out_ref[r0:r0 + chunk, :] = jnp.sum(
                jnp.where(col == bidx, logits, 0.0), axis=-1, keepdims=True)

    return kernel


def _round_up(x, m):
    return ((x + m - 1) // m) * m


def nnue_forward(stm_indices, nstm_indices, params, *, block_b=256, chunk_rows=128):
    """stm_indices / nstm_indices: (B, T) int32, padded with N_FEATURES."""
    w, b, hw, hb = params['w'], params['b'], params['hw'], params['hb']
    B, T = stm_indices.shape
    L1 = w.shape[1]

    # Batch tile: multiple of 8 sublanes, capped at block_b (256 by default so the
    # "parallel" grid axis has >= 2 steps for realistic batches -> v7x megacore).
    TB = min(_round_up(block_b, 8), _round_up(B, 8))
    B_pad = _round_up(B, TB)

    # Pre-stack stm ++ nstm along the index axis -> one (B, 2T) input stream.
    idx = jnp.concatenate([stm_indices.astype(jnp.int32),
                           nstm_indices.astype(jnp.int32)], axis=1)
    if B_pad != B:
        idx = jnp.pad(idx, ((0, B_pad - B), (0, 0)), constant_values=N_FEATURES)

    # In-kernel chunking (MXU of chunk c overlaps VPU build of chunk c+1) and
    # sub-blocking (register-resident multi-hot accumulation).
    chunk = TB if (TB <= chunk_rows or TB % chunk_rows != 0) else chunk_rows
    sub = 16 if chunk % 16 == 0 else 8
    n_chunks = TB // chunk

    # Drop the padding row -> K = 768 = 6*128 (MXU aligned); table in bf16.
    w_bf = w[:N_FEATURES].astype(jnp.bfloat16)                 # (768, L1)
    b2d = b.reshape(1, L1).astype(jnp.float32)                 # (1, L1)
    hw_stm = hw[:, :L1].T.astype(jnp.float32)                  # (L1, 8)
    hw_nstm = hw[:, L1:].T.astype(jnp.float32)                 # (L1, 8)
    hb2d = hb.reshape(1, N_BUCKETS).astype(jnp.float32)        # (1, 8)

    grid = (B_pad // TB,)
    resident = lambda shape: pl.BlockSpec(shape, lambda i: (0, 0))

    flops = 2 * B_pad * (2 * N_FEATURES * L1 + 2 * L1 * N_BUCKETS)
    bytes_accessed = (idx.size * 4 + B_pad * 4
                      + N_FEATURES * L1 * 2 + L1 * 4
                      + 2 * L1 * N_BUCKETS * 4 + N_BUCKETS * 4)

    out = pl.pallas_call(
        make_nnue_kernel(T, chunk, sub, n_chunks),
        out_shape=jax.ShapeDtypeStruct((B_pad, 1), jnp.float32),
        grid=grid,
        in_specs=[
            pl.BlockSpec((TB, 2 * T), lambda i: (i, 0)),       # stacked indices (batch-tiled)
            resident((N_FEATURES, L1)),                        # embedding table (VMEM-resident)
            resident((1, L1)),                                 # embedding bias
            resident((L1, N_BUCKETS)),                         # head weights, stm half
            resident((L1, N_BUCKETS)),                         # head weights, nstm half
            resident((1, N_BUCKETS)),                          # head bias
        ],
        out_specs=pl.BlockSpec((TB, 1), lambda i: (i, 0)),
        compiler_params=pltpu.CompilerParams(
            dimension_semantics=("parallel",),                 # megacore sharding on v7x
            vmem_limit_bytes=32 * 1024 * 1024,
        ),
        cost_estimate=pl.CostEstimate(flops=flops, transcendentals=0,
                                      bytes_accessed=bytes_accessed),
    )(idx, w_bf, b2d, hw_stm, hw_nstm, hb2d)
    return out[:B]


def nnue_reference(stm_indices, nstm_indices, params):
    w, b, hw, hb = params['w'], params['b'], params['hw'], params['hb']

    def embed(idx):
        mask = (idx != N_FEATURES)
        gathered = jnp.where(mask[..., None], w[idx], 0.0)
        return gathered.sum(axis=1) + b

    emb = jnp.clip(jnp.concatenate([embed(stm_indices), embed(nstm_indices)],
                                   axis=-1), 0.0, 1.0)
    logits = emb @ hw.T + hb
    cnt = (stm_indices != N_FEATURES).sum(axis=-1, keepdims=True)
    bidx = jnp.clip((cnt - 1) // 4, 0, N_BUCKETS - 1)
    return jnp.take_along_axis(logits, bidx, axis=-1)


if __name__ == "__main__":
    L1 = 32     # hyperparameters['L1']
    B, T = 2, 8

    key = jax.random.PRNGKey(0)
    k_w, k_b, k_hw, k_hb, k_stm, k_nstm = jax.random.split(key, 6)

    scale = 1.0 / math.sqrt(N_FEATURES)
    params = {
        'w': jax.random.uniform(k_w, (N_FEATURES + 1, L1), jnp.float32, -scale, scale),
        'b': jax.random.uniform(k_b, (L1,), jnp.float32, -scale, scale),
        # Linear(2*L1, 1) x 8 heads (PyTorch default-style uniform bound)
        'hw': jax.random.uniform(k_hw, (8, 2 * L1), jnp.float32,
                                 -1.0 / math.sqrt(2 * L1), 1.0 / math.sqrt(2 * L1)),
        'hb': jax.random.uniform(k_hb, (8,), jnp.float32,
                                 -1.0 / math.sqrt(2 * L1), 1.0 / math.sqrt(2 * L1)),
    }

    stm_idx = jax.random.randint(k_stm, (B, T), 0, N_FEATURES).astype(jnp.int32)
    nstm_idx = jax.random.randint(k_nstm, (B, T), 0, N_FEATURES).astype(jnp.int32)
    # pad tail of row 0 with the padding index (N_FEATURES)
    stm_idx = stm_idx.at[0, 5:].set(N_FEATURES)
    nstm_idx = nstm_idx.at[0, 5:].set(N_FEATURES)

    out = nnue_forward(stm_idx, nstm_idx, params)
    out = jax.block_until_ready(out)

    ref = nnue_reference(stm_idx, nstm_idx, params)
    # Tolerance relaxed vs pure-f32: the embedding matmul runs bf16-in / f32-accum
    # on the MXU (counts are exact; table rows lose ~3 decimal digits).
    np.testing.assert_allclose(np.asarray(out), np.asarray(ref), rtol=1e-2, atol=1e-2)

    print("KERNEL_OK")
</pallas_src>

<mosaic_0001>
module attributes {stable_mosaic.version = 11 : i64} {
  func.func @kernel(%arg0: i32, %arg1: memref<8x16xi32, #tpu.memory_space<vmem>>, %arg2: memref<768x32xbf16, #tpu.memory_space<vmem>>, %arg3: memref<1x32xf32, #tpu.memory_space<vmem>>, %arg4: memref<32x8xf32, #tpu.memory_space<vmem>>, %arg5: memref<32x8xf32, #tpu.memory_space<vmem>>, %arg6: memref<1x8xf32, #tpu.memory_space<vmem>>, %arg7: memref<8x1xf32, #tpu.memory_space<vmem>>) attributes {dimension_semantics = [#tpu.dimension_semantics<parallel>], iteration_bounds = array<i64: 1>, scalar_prefetch = 0 : i64, scratch_operands = 0 : i64, tpu.core_type = #tpu.core_type<tc>, window_params = [{transform_indices = @transform_0, window_bounds = array<i64: 8, 16>}, {pipeline_mode = #tpu.pipeline_mode<synchronous>, transform_indices = @transform_1, window_bounds = array<i64: 768, 32>}, {pipeline_mode = #tpu.pipeline_mode<synchronous>, transform_indices = @transform_2, window_bounds = array<i64: 1, 32>}, {pipeline_mode = #tpu.pipeline_mode<synchronous>, transform_indices = @transform_3, window_bounds = array<i64: 32, 8>}, {pipeline_mode = #tpu.pipeline_mode<synchronous>, transform_indices = @transform_4, window_bounds = array<i64: 32, 8>}, {pipeline_mode = #tpu.pipeline_mode<synchronous>, transform_indices = @transform_5, window_bounds = array<i64: 1, 8>}, {transform_indices = @transform_6, window_bounds = array<i64: 8, 1>}]} {
    %c0 = arith.constant 0 : index
    %c0_0 = arith.constant 0 : index
    %0 = vector.load %arg1[%c0, %c0_0] : memref<8x16xi32, #tpu.memory_space<vmem>>, vector<8x16xi32>
    %1 = vector.extract_strided_slice %0 {offsets = [0, 0], sizes = [8, 8], strides = [1, 1]} : vector<8x16xi32> to vector<8x8xi32>
    %2 = vector.extract_strided_slice %0 {offsets = [0, 8], sizes = [8, 8], strides = [1, 1]} : vector<8x16xi32> to vector<8x8xi32>
    %3 = tpu.iota {dimensions = array<i32: 1>} : vector<8x768xi32>
    %cst = arith.constant 0.000000e+00 : f32
    %4 = vector.broadcast %cst : f32 to vector<8x768xf32>
    %5 = vector.extract_strided_slice %1 {offsets = [0, 0], sizes = [8, 1], strides = [1, 1]} : vector<8x8xi32> to vector<8x1xi32>
    %6 = vector.broadcast %5 : vector<8x1xi32> to vector<8x768xi32>
    %7 = arith.cmpi eq, %3, %6 : vector<8x768xi32>
    %8 = arith.extui %7 : vector<8x768xi1> to vector<8x768xi32>
    %9 = arith.sitofp %8 : vector<8x768xi32> to vector<8x768xf32>
    %10 = arith.addf %4, %9 : vector<8x768xf32>
    %11 = vector.extract_strided_slice %1 {offsets = [0, 1], sizes = [8, 1], strides = [1, 1]} : vector<8x8xi32> to vector<8x1xi32>
    %12 = vector.broadcast %11 : vector<8x1xi32> to vector<8x768xi32>
    %13 = arith.cmpi eq, %3, %12 : vector<8x768xi32>
    %14 = arith.extui %13 : vector<8x768xi1> to vector<8x768xi32>
    %15 = arith.sitofp %14 : vector<8x768xi32> to vector<8x768xf32>
    %16 = arith.addf %10, %15 : vector<8x768xf32>
    %17 = vector.extract_strided_slice %1 {offsets = [0, 2], sizes = [8, 1], strides = [1, 1]} : vector<8x8xi32> to vector<8x1xi32>
    %18 = vector.broadcast %17 : vector<8x1xi32> to vector<8x768xi32>
    %19 = arith.cmpi eq, %3, %18 : vector<8x768xi32>
    %20 = arith.extui %19 : vector<8x768xi1> to vector<8x768xi32>
    %21 = arith.sitofp %20 : vector<8x768xi32> to vector<8x768xf32>
    %22 = arith.addf %16, %21 : vector<8x768xf32>
    %23 = vector.extract_strided_slice %1 {offsets = [0, 3], sizes = [8, 1], strides = [1, 1]} : vector<8x8xi32> to vector<8x1xi32>
    %24 = vector.broadcast %23 : vector<8x1xi32> to vector<8x768xi32>
    %25 = arith.cmpi eq, %3, %24 : vector<8x768xi32>
    %26 = arith.extui %25 : vector<8x768xi1> to vector<8x768xi32>
    %27 = arith.sitofp %26 : vector<8x768xi32> to vector<8x768xf32>
    %28 = arith.addf %22, %27 : vector<8x768xf32>
    %29 = vector.extract_strided_slice %1 {offsets = [0, 4], sizes = [8, 1], strides = [1, 1]} : vector<8x8xi32> to vector<8x1xi32>
    %30 = vector.broadcast %29 : vector<8x1xi32> to vector<8x768xi32>
    %31 = arith.cmpi eq, %3, %30 : vector<8x768xi32>
    %32 = arith.extui %31 : vector<8x768xi1> to vector<8x768xi32>
    %33 = arith.sitofp %32 : vector<8x768xi32> to vector<8x768xf32>
    %34 = arith.addf %28, %33 : vector<8x768xf32>
    %35 = vector.extract_strided_slice %1 {offsets = [0, 5], sizes = [8, 1], strides = [1, 1]} : vector<8x8xi32> to vector<8x1xi32>
    %36 = vector.broadcast %35 : vector<8x1xi32> to vector<8x768xi32>
    %37 = arith.cmpi eq, %3, %36 : vector<8x768xi32>
    %38 = arith.extui %37 : vector<8x768xi1> to vector<8x768xi32>
    %39 = arith.sitofp %38 : vector<8x768xi32> to vector<8x768xf32>
    %40 = arith.addf %34, %39 : vector<8x768xf32>
    %41 = vector.extract_strided_slice %1 {offsets = [0, 6], sizes = [8, 1], strides = [1, 1]} : vector<8x8xi32> to vector<8x1xi32>
    %42 = vector.broadcast %41 : vector<8x1xi32> to vector<8x768xi32>
    %43 = arith.cmpi eq, %3, %42 : vector<8x768xi32>
    %44 = arith.extui %43 : vector<8x768xi1> to vector<8x768xi32>
    %45 = arith.sitofp %44 : vector<8x768xi32> to vector<8x768xf32>
    %46 = arith.addf %40, %45 : vector<8x768xf32>
    %47 = vector.extract_strided_slice %1 {offsets = [0, 7], sizes = [8, 1], strides = [1, 1]} : vector<8x8xi32> to vector<8x1xi32>
    %48 = vector.broadcast %47 : vector<8x1xi32> to vector<8x768xi32>
    %49 = arith.cmpi eq, %3, %48 : vector<8x768xi32>
    %50 = arith.extui %49 : vector<8x768xi1> to vector<8x768xi32>
    %51 = arith.sitofp %50 : vector<8x768xi32> to vector<8x768xf32>
    %52 = arith.addf %46, %51 : vector<8x768xf32>
    %53 = arith.truncf %52 : vector<8x768xf32> to vector<8x768xbf16>
    %54 = tpu.iota {dimensions = array<i32: 1>} : vector<8x768xi32>
    %cst_1 = arith.constant 0.000000e+00 : f32
    %55 = vector.broadcast %cst_1 : f32 to vector<8x768xf32>
    %56 = vector.extract_strided_slice %2 {offsets = [0, 0], sizes = [8, 1], strides = [1, 1]} : vector<8x8xi32> to vector<8x1xi32>
    %57 = vector.broadcast %56 : vector<8x1xi32> to vector<8x768xi32>
    %58 = arith.cmpi eq, %54, %57 : vector<8x768xi32>
    %59 = arith.extui %58 : vector<8x768xi1> to vector<8x768xi32>
    %60 = arith.sitofp %59 : vector<8x768xi32> to vector<8x768xf32>
    %61 = arith.addf %55, %60 : vector<8x768xf32>
    %62 = vector.extract_strided_slice %2 {offsets = [0, 1], sizes = [8, 1], strides = [1, 1]} : vector<8x8xi32> to vector<8x1xi32>
    %63 = vector.broadcast %62 : vector<8x1xi32> to vector<8x768xi32>
    %64 = arith.cmpi eq, %54, %63 : vector<8x768xi32>
    %65 = arith.extui %64 : vector<8x768xi1> to vector<8x768xi32>
    %66 = arith.sitofp %65 : vector<8x768xi32> to vector<8x768xf32>
    %67 = arith.addf %61, %66 : vector<8x768xf32>
    %68 = vector.extract_strided_slice %2 {offsets = [0, 2], sizes = [8, 1], strides = [1, 1]} : vector<8x8xi32> to vector<8x1xi32>
    %69 = vector.broadcast %68 : vector<8x1xi32> to vector<8x768xi32>
    %70 = arith.cmpi eq, %54, %69 : vector<8x768xi32>
    %71 = arith.extui %70 : vector<8x768xi1> to vector<8x768xi32>
    %72 = arith.sitofp %71 : vector<8x768xi32> to vector<8x768xf32>
    %73 = arith.addf %67, %72 : vector<8x768xf32>
    %74 = vector.extract_strided_slice %2 {offsets = [0, 3], sizes = [8, 1], strides = [1, 1]} : vector<8x8xi32> to vector<8x1xi32>
    %75 = vector.broadcast %74 : vector<8x1xi32> to vector<8x768xi32>
    %76 = arith.cmpi eq, %54, %75 : vector<8x768xi32>
    %77 = arith.extui %76 : vector<8x768xi1> to vector<8x768xi32>
    %78 = arith.sitofp %77 : vector<8x768xi32> to vector<8x768xf32>
    %79 = arith.addf %73, %78 : vector<8x768xf32>
    %80 = vector.extract_strided_slice %2 {offsets = [0, 4], sizes = [8, 1], strides = [1, 1]} : vector<8x8xi32> to vector<8x1xi32>
    %81 = vector.broadcast %80 : vector<8x1xi32> to vector<8x768xi32>
    %82 = arith.cmpi eq, %54, %81 : vector<8x768xi32>
    %83 = arith.extui %82 : vector<8x768xi1> to vector<8x768xi32>
    %84 = arith.sitofp %83 : vector<8x768xi32> to vector<8x768xf32>
    %85 = arith.addf %79, %84 : vector<8x768xf32>
    %86 = vector.extract_strided_slice %2 {offsets = [0, 5], sizes = [8, 1], strides = [1, 1]} : vector<8x8xi32> to vector<8x1xi32>
    %87 = vector.broadcast %86 : vector<8x1xi32> to vector<8x768xi32>
    %88 = arith.cmpi eq, %54, %87 : vector<8x768xi32>
    %89 = arith.extui %88 : vector<8x768xi1> to vector<8x768xi32>
    %90 = arith.sitofp %89 : vector<8x768xi32> to vector<8x768xf32>
    %91 = arith.addf %85, %90 : vector<8x768xf32>
    %92 = vector.extract_strided_slice %2 {offsets = [0, 6], sizes = [8, 1], strides = [1, 1]} : vector<8x8xi32> to vector<8x1xi32>
    %93 = vector.broadcast %92 : vector<8x1xi32> to vector<8x768xi32>
    %94 = arith.cmpi eq, %54, %93 : vector<8x768xi32>
    %95 = arith.extui %94 : vector<8x768xi1> to vector<8x768xi32>
    %96 = arith.sitofp %95 : vector<8x768xi32> to vector<8x768xf32>
    %97 = arith.addf %91, %96 : vector<8x768xf32>
    %98 = vector.extract_strided_slice %2 {offsets = [0, 7], sizes = [8, 1], strides = [1, 1]} : vector<8x8xi32> to vector<8x1xi32>
    %99 = vector.broadcast %98 : vector<8x1xi32> to vector<8x768xi32>
    %100 = arith.cmpi eq, %54, %99 : vector<8x768xi32>
    %101 = arith.extui %100 : vector<8x768xi1> to vector<8x768xi32>
    %102 = arith.sitofp %101 : vector<8x768xi32> to vector<8x768xf32>
    %103 = arith.addf %97, %102 : vector<8x768xf32>
    %104 = arith.truncf %103 : vector<8x768xf32> to vector<8x768xbf16>
    %c0_2 = arith.constant 0 : index
    %c0_3 = arith.constant 0 : index
    %105 = vector.load %arg2[%c0_2, %c0_3] : memref<768x32xbf16, #tpu.memory_space<vmem>>, vector<768x32xbf16>
    %cst_4 = arith.constant dense<0.000000e+00> : vector<8x32xf32>
    %106 = tpu.matmul %53, %105, %cst_4 {dimension_numbers = #tpu.dot_dimension_numbers<[1], [0], [0], [1], [0, 0, 1, 1], [], []>} : vector<8x768xbf16>, vector<768x32xbf16>, vector<8x32xf32> -> vector<8x32xf32>
    %c0_5 = arith.constant 0 : index
    %c0_6 = arith.constant 0 : index
    %107 = vector.load %arg2[%c0_5, %c0_6] : memref<768x32xbf16, #tpu.memory_space<vmem>>, vector<768x32xbf16>
    %cst_7 = arith.constant dense<0.000000e+00> : vector<8x32xf32>
    %108 = tpu.matmul %104, %107, %cst_7 {dimension_numbers = #tpu.dot_dimension_numbers<[1], [0], [0], [1], [0, 0, 1, 1], [], []>} : vector<8x768xbf16>, vector<768x32xbf16>, vector<8x32xf32> -> vector<8x32xf32>
    %c0_8 = arith.constant 0 : index
    %c0_9 = arith.constant 0 : index
    %109 = vector.load %arg3[%c0_8, %c0_9] : memref<1x32xf32, #tpu.memory_space<vmem>>, vector<1x32xf32>
    %110 = vector.broadcast %109 : vector<1x32xf32> to vector<8x32xf32>
    %111 = arith.addf %106, %110 : vector<8x32xf32>
    %cst_10 = arith.constant 0.000000e+00 : f32
    %cst_11 = arith.constant 1.000000e+00 : f32
    %112 = vector.broadcast %cst_10 : f32 to vector<8x32xf32>
    %113 = arith.maximumf %112, %111 : vector<8x32xf32>
    %114 = vector.broadcast %cst_11 : f32 to vector<8x32xf32>
    %115 = arith.minimumf %114, %113 : vector<8x32xf32>
    %c0_12 = arith.constant 0 : index
    %c0_13 = arith.constant 0 : index
    %116 = vector.load %arg3[%c0_12, %c0_13] : memref<1x32xf32, #tpu.memory_space<vmem>>, vector<1x32xf32>
    %117 = vector.broadcast %116 : vector<1x32xf32> to vector<8x32xf32>
    %118 = arith.addf %108, %117 : vector<8x32xf32>
    %cst_14 = arith.constant 0.000000e+00 : f32
    %cst_15 = arith.constant 1.000000e+00 : f32
    %119 = vector.broadcast %cst_14 : f32 to vector<8x32xf32>
    %120 = arith.maximumf %119, %118 : vector<8x32xf32>
    %121 = vector.broadcast %cst_15 : f32 to vector<8x32xf32>
    %122 = arith.minimumf %121, %120 : vector<8x32xf32>
    %c0_16 = arith.constant 0 : index
    %c0_17 = arith.constant 0 : index
    %123 = vector.load %arg4[%c0_16, %c0_17] : memref<32x8xf32, #tpu.memory_space<vmem>>, vector<32x8xf32>
    %cst_18 = arith.constant dense<0.000000e+00> : vector<8x8xf32>
    %124 = tpu.matmul %115, %123, %cst_18 {dimension_numbers = #tpu.dot_dimension_numbers<[1], [0], [0], [1], [0, 0, 1, 1], [], []>} : vector<8x32xf32>, vector<32x8xf32>, vector<8x8xf32> -> vector<8x8xf32>
    %c0_19 = arith.constant 0 : index
    %c0_20 = arith.constant 0 : index
    %125 = vector.load %arg5[%c0_19, %c0_20] : memref<32x8xf32, #tpu.memory_space<vmem>>, vector<32x8xf32>
    %cst_21 = arith.constant dense<0.000000e+00> : vector<8x8xf32>
    %126 = tpu.matmul %122, %125, %cst_21 {dimension_numbers = #tpu.dot_dimension_numbers<[1], [0], [0], [1], [0, 0, 1, 1], [], []>} : vector<8x32xf32>, vector<32x8xf32>, vector<8x8xf32> -> vector<8x8xf32>
    %127 = arith.addf %124, %126 : vector<8x8xf32>
    %c0_22 = arith.constant 0 : index
    %c0_23 = arith.constant 0 : index
    %128 = vector.load %arg6[%c0_22, %c0_23] : memref<1x8xf32, #tpu.memory_space<vmem>>, vector<1x8xf32>
    %129 = vector.broadcast %128 : vector<1x8xf32> to vector<8x8xf32>
    %130 = arith.addf %127, %129 : vector<8x8xf32>
    %c768_i32 = arith.constant 768 : i32
    %131 = vector.broadcast %c768_i32 : i32 to vector<8x8xi32>
    %132 = arith.cmpi ne, %1, %131 : vector<8x8xi32>
    %133 = arith.extui %132 : vector<8x8xi1> to vector<8x8xi32>
    %cst_24 = arith.constant dense<0> : vector<8xi32>
    %134 = vector.multi_reduction <add>, %133, %cst_24 [1] : vector<8x8xi32> to vector<8xi32>
    %135 = vector.shape_cast %134 : vector<8xi32> to vector<8x1xi32>
    %c1_i32 = arith.constant 1 : i32
    %136 = vector.broadcast %c1_i32 : i32 to vector<8x1xi32>
    %137 = arith.subi %135, %136 : vector<8x1xi32>
    %c2_i32 = arith.constant 2 : i32
    %138 = vector.broadcast %c2_i32 : i32 to vector<8x1xi32>
    %139 = arith.shrsi %137, %138 : vector<8x1xi32>
    %c0_i32 = arith.constant 0 : i32
    %c7_i32 = arith.constant 7 : i32
    %140 = vector.broadcast %c0_i32 : i32 to vector<8x1xi32>
    %141 = arith.maxsi %140, %139 : vector<8x1xi32>
    %142 = vector.broadcast %c7_i32 : i32 to vector<8x1xi32>
    %143 = arith.minsi %142, %141 : vector<8x1xi32>
    %144 = tpu.iota {dimensions = array<i32: 1>} : vector<8x8xi32>
    %145 = vector.broadcast %143 : vector<8x1xi32> to vector<8x8xi32>
    %146 = arith.cmpi eq, %144, %145 : vector<8x8xi32>
    %cst_25 = arith.constant 0.000000e+00 : f32
    %147 = vector.broadcast %cst_25 : f32 to vector<8x8xf32>
    %148 = arith.select %146, %130, %147 : vector<8x8xi1>, vector<8x8xf32>
    %cst_26 = arith.constant dense<0.000000e+00> : vector<8xf32>
    %149 = vector.multi_reduction <add>, %148, %cst_26 [1] : vector<8x8xf32> to vector<8xf32>
    %150 = vector.shape_cast %149 : vector<8xf32> to vector<8x1xf32>
    %c0_27 = arith.constant 0 : index
    %c0_28 = arith.constant 0 : index
    %151 = vector.load %arg7[%c0_27, %c0_28] : memref<8x1xf32, #tpu.memory_space<vmem>>, vector<8x1xf32>
    tpu.vector_store %arg7[%c0_27, %c0_28], %150 {strides = array<i32>} : memref<8x1xf32, #tpu.memory_space<vmem>>, vector<8x1xf32>,
    return
  }
  func.func @transform_0(%arg0: i32) -> (i32, i32) {
    %c0_i32 = arith.constant 0 : i32
    %c0_i32_0 = arith.constant 0 : i32
    return %arg0, %c0_i32 : i32, i32
  }
  func.func @transform_1(%arg0: i32) -> (i32, i32) {
    %c0_i32 = arith.constant 0 : i32
    %c0_i32_0 = arith.constant 0 : i32
    %c0_i32_1 = arith.constant 0 : i32
    return %c0_i32, %c0_i32_0 : i32, i32
  }
  func.func @transform_2(%arg0: i32) -> (i32, i32) {
    %c0_i32 = arith.constant 0 : i32
    %c0_i32_0 = arith.constant 0 : i32
    %c0_i32_1 = arith.constant 0 : i32
    return %c0_i32, %c0_i32_0 : i32, i32
  }
  func.func @transform_3(%arg0: i32) -> (i32, i32) {
    %c0_i32 = arith.constant 0 : i32
    %c0_i32_0 = arith.constant 0 : i32
    %c0_i32_1 = arith.constant 0 : i32
    return %c0_i32, %c0_i32_0 : i32, i32
  }
  func.func @transform_4(%arg0: i32) -> (i32, i32) {
    %c0_i32 = arith.constant 0 : i32
    %c0_i32_0 = arith.constant 0 : i32
    %c0_i32_1 = arith.constant 0 : i32
    return %c0_i32, %c0_i32_0 : i32, i32
  }
  func.func @transform_5(%arg0: i32) -> (i32, i32) {
    %c0_i32 = arith.constant 0 : i32
    %c0_i32_0 = arith.constant 0 : i32
    %c0_i32_1 = arith.constant 0 : i32
    return %c0_i32, %c0_i32_0 : i32, i32
  }
  func.func @transform_6(%arg0: i32) -> (i32, i32) {
    %c0_i32 = arith.constant 0 : i32
    %c0_i32_0 = arith.constant 0 : i32
    return %arg0, %c0_i32 : i32, i32
  }
}

</mosaic_0001>

<bundles_post_ra>
// kernel: tpu_custom_call.1
= control target key start
LH: loop header
LB: loop body
LE: loop exit
PB: predicated region body
PF: predicated region fallthrough
CT: control target
= control target key end

     0   :  { %v1716_v0 = vmov 2   ;;  %v1717_v1 = vmov 0   ;;  %v1718_v6 = vmov 3   ;;  %v1719_v7 = vmov 1   ;;  %s2632_s0 = inlined_call_operand.vmem [shape: s32[8,16], index: 0, kind: input, shape index: {}]   ;;  %s2633_s1 = inlined_call_operand.vmem [shape: bf16[768,32], index: 1, kind: input, shape index: {}]   ;;  %s2634_s3 = inlined_call_operand.vmem [shape: f32[32,8], index: 3, kind: input, shape index: {}]   ;;  %s2635_s4 = inlined_call_operand.vmem [shape: f32[32,8], index: 4, kind: input, shape index: {}]   ;;  %s2636_s2 = inlined_call_operand.vmem [shape: f32[1,32], index: 2, kind: input, shape index: {}]   ;;  %s2637_s5 = inlined_call_operand.vmem [shape: f32[1,8], index: 5, kind: input, shape index: {}]   ;;  %s2638_s6 = inlined_call_operand.vmem [shape: f32[8,1], index: 6, kind: output, shape index: {}]  }
   0x1   :  { %1653 = vset.pattern.permute.xlu1 %v1716_v0  ;;  %1651 = vset.pattern.permute.xlu0 %v1717_v1  ;;  %v1773_v2 = vld [vmem:[%s2632_s0] sm:$0xff]  ;;  %v1808_v10 = vld [vmem:[%s2633_s1 + $0x48] sm:$0xff]   ;;  %v1720_v13 = vmov 4   ;;  %v1721_v14 = vmov 5   ;;  %v1832_v16 = vld [vmem:[%s2633_s1 + $0x50] sm:$0xff]   ;;  %v1722_v20 = vmov 6   ;;  %v25_v51 = vlaneseq }
   0x2   :  { %v1778_v3 = vld [vmem:[%s2633_s1 + $0x40] sm:$0xff]   ;;  %vm1274_vm0 = vcmp.ne.s32.totalorder %v1773_v2, 768  ;;  %87 = vperm.xlu1 %1653, %v1773_v2   ;;  %33 = vperm.xlu0 %1651, %v1773_v2   ;;  %v1814_v11 = vld [vmem:[%s2633_s1 + $0xc8] sm:$0xff]   ;;  %v1839_v17 = vld [vmem:[%s2633_s1 + $0xd0] sm:$0xff]   ;;  %v1723_v21 = vmov 8   ;;  %v1724_v27 = vmov 7  }
   0x3   :  { %v1783_v4 = vsel %vm1274_vm0, 1, %v1717_v1  ;;  %1456 = vmatprep.subr.bf16.mxu0 %v1778_v3  ;;  %v1789_v5 = vld [vmem:[%s2633_s1 + $0xc0] sm:$0xff]   ;;  %v1820_v12 = vld [vmem:[%s2633_s1 + $0x8] sm:$0xff]   ;;  %v1846_v18 = vld [vmem:[%s2633_s1 + $0x10] sm:$0xff]   ;;  %v1725_v28 = vmov 11   ;;  %v1726_v34 = vmov 9  }
   0x4   :  { %2651 = vst [vmem:[#allocation2_spill] sm:$0xff] %v1783_v4  ;;  %v1794_v8 = vld [vmem:[%s2633_s1] sm:$0xff]   ;;  %1478 = vmatprep.subr.bf16.mxu1 %v1789_v5  ;;  %v1825_v15 = vld [vmem:[%s2633_s1 + $0x88] sm:$0xff]   ;;  %v1852_v19 = vld [vmem:[%s2633_s1 + $0x90] sm:$0xff]   ;;  %v1727_v35 = vmov 14   ;;  %v1728_v41 = vmov 10  }
   0x5   :  { %v1801_v9 = vld [vmem:[%s2633_s1 + $0x80] sm:$0xff]   ;;  %1457 = vmatpush3.bf16.msra.mxu0 %v1794_v8  ;;  %v1857_v22 = vld [vmem:[%s2633_s1 + $0x58] sm:$0xff]   ;;  %v1909_v32 = vld [vmem:[%s2633_s1 + $0x68] sm:$0xff]   ;;  %v1729_v43 = vmov 15   ;;  %v1730_v48 = vmov 12   ;;  %v1731_v50 = vmov 13  }
   0x6   :  { %1654 = vset.pattern.permute.xlu1 %v1718_v6  ;;  %1652 = vset.pattern.permute.xlu0 %v1719_v7  ;;  %v1864_v23 = vld [vmem:[%s2633_s1 + $0xd8] sm:$0xff]   ;;  %v1883_v26 = vld [vmem:[%s2633_s1 + $0x60] sm:$0xff]   ;;  %v1914_v33 = vld [vmem:[%s2633_s1 + $0xe8] sm:$0xff]   ;;  %v1993_v52 = vand.u32 127, %v25_v51  ;;  %v1732_v62 = vmov 0.0  }
   0x7   :  { %114 = vperm.xlu1 %1654, %v1773_v2   ;;  %60 = vperm.xlu0 %1652, %v1773_v2   ;;  %v1871_v24 = vld [vmem:[%s2633_s1 + $0x18] sm:$0xff]   ;;  %v1888_v29 = vld [vmem:[%s2633_s1 + $0xe0] sm:$0xff]   ;;  %2653 = vst [vmem:[#allocation4_spill] sm:$0xff] %v1914_v33  ;;  %v1919_v36 = vld [vmem:[%s2633_s1 + $0x28] sm:$0xff]  }
   0x8   :  { %1479 = vmatpush3.bf16.msra.mxu1 %v1801_v9  ;;  %1458 = vmatprep.subr.bf16.mxu0 %v1808_v10  ;;  %v1878_v25 = vld [vmem:[%s2633_s1 + $0x98] sm:$0xff]   ;;  %v1895_v30 = vld [vmem:[%s2633_s1 + $0x20] sm:$0xff]   ;;  %v1926_v37 = vld [vmem:[%s2633_s1 + $0xa8] sm:$0xff]   ;;  %v1996_v53 = vadd.s32 256, %v1993_v52  ;;  %v1999_v54 = vadd.s32 640, %v1993_v52  ;;  %v2004_v57 = vadd.s32 128, %v1993_v52 }
   0x9   :  { %1480 = vmatprep.subr.bf16.mxu1 %v1814_v11  ;;  %1459 = vmatpush3.bf16.msra.mxu0 %v1820_v12  ;;  %v1902_v31 = vld [vmem:[%s2633_s1 + $0xa0] sm:$0xff]   ;;  %2654 = vst [vmem:[#allocation5_spill] sm:$0xff] %v1926_v37  ;;  %v1933_v38 = vld [vmem:[%s2633_s1 + $0x70] sm:$0xff]   ;;  %v1957_v44 = vld [vmem:[%s2633_s1 + $0x78] sm:$0xff]   ;;  %v2007_v58 = vadd.s32 384, %v1993_v52  ;;  %v2016_v59 = vadd.s32 512, %v1993_v52 }
   0xa   :  { %1460 = vmatprep.subr.bf16.mxu0 %v1832_v16  ;;  %2652 = vst [vmem:[#allocation3_spill] sm:$0xff] %v1902_v31  ;;  %v1940_v39 = vld [vmem:[%s2633_s1 + $0xf0] sm:$0xff]   ;;  %v1964_v45 = vld [vmem:[%s2633_s1 + $0xf8] sm:$0xff]   ;;  %v1981_v49 = vld [vmem:[%s2633_s1 + $0x140] sm:$0xff]  }
   0xb   :  { %1655 = vset.pattern.permute.xlu1 %v1720_v13  ;;  %1656 = vset.pattern.permute.xlu0 %v1721_v14  ;;  %2655 = vst [vmem:[#allocation6_spill] sm:$0xff] %v1940_v39  ;;  %v1945_v40 = vld [vmem:[%s2633_s1 + $0x30] sm:$0xff]   ;;  %2657 = vst [vmem:[#allocation8_spill] sm:$0xff] %v1964_v45  ;;  %v1970_v46 = vld [vmem:[%s2633_s1 + $0x38] sm:$0xff]  }
   0xc   :  { %141 = vperm.xlu1 %1655, %v1773_v2   ;;  %168 = vperm.xlu0 %1656, %v1773_v2   ;;  %v1950_v42 = vld [vmem:[%s2633_s1 + $0xb0] sm:$0xff]   ;;  %v1975_v47 = vld [vmem:[%s2633_s1 + $0xb8] sm:$0xff]  }
   0xd   :  { %1481 = vmatpush3.bf16.msra.mxu1 %v1825_v15  ;;  %1461 = vmatpush3.bf16.msra.mxu0 %v1846_v18  ;;  %2656 = vst [vmem:[#allocation7_spill] sm:$0xff] %v1950_v42  ;;  %2658 = vst [vmem:[#allocation9_spill] sm:$0xff] %v1975_v47 }
   0xe   :  { %1482 = vmatprep.subr.bf16.mxu1 %v1839_v17  ;;  %1462 = vmatprep.subr.bf16.mxu0 %v1857_v22 }
  0x10   :  { %1657 = vset.pattern.permute.xlu1 %v1722_v20  ;;  %1659 = vset.pattern.permute.xlu0 %v1723_v21 }
  0x11   :  { %195 = vperm.xlu1 %1657, %v1773_v2   ;;  %255 = vperm.xlu0 %1659, %v1773_v2  }
  0x12   :  { %1483 = vmatpush3.bf16.msra.mxu1 %v1852_v19  ;;  %1463 = vmatpush3.bf16.msra.mxu0 %v1871_v24 }
  0x13   :  { %1484 = vmatprep.subr.bf16.mxu1 %v1864_v23  ;;  %1464 = vmatprep.subr.bf16.mxu0 %v1883_v26 }
  0x15   :  { %1658 = vset.pattern.permute.xlu1 %v1724_v27  ;;  %1662 = vset.pattern.permute.xlu0 %v1725_v28 }
  0x16   :  { %222 = vperm.xlu1 %1658, %v1773_v2   ;;  %336 = vperm.xlu0 %1662, %v1773_v2  }
  0x17   :  { %1485 = vmatpush3.bf16.msra.mxu1 %v1878_v25  ;;  %1465 = vmatpush3.bf16.msra.mxu0 %v1895_v30 }
  0x18   :  { %1486 = vmatprep.subr.bf16.mxu1 %v1888_v29  ;;  %1466 = vmatprep.subr.bf16.mxu0 %v1909_v32 }
  0x1a   :  { %1660 = vset.pattern.permute.xlu1 %v1726_v34  ;;  %1665 = vset.pattern.permute.xlu0 %v1727_v35 }
  0x1b   :  { %282 = vperm.xlu1 %1660, %v1773_v2   ;;  %417 = vperm.xlu0 %1665, %v1773_v2  }
  0x1c   :  { %1487 = vmatpush3.bf16.msra.mxu1 %v1902_v31  ;;  %1467 = vmatpush3.bf16.msra.mxu0 %v1919_v36 }
  0x1d   :  { %1488 = vmatprep.subr.bf16.mxu1 %v1914_v33  ;;  %1468 = vmatprep.subr.bf16.mxu0 %v1933_v38 }
  0x1f   :  { %1661 = vset.pattern.permute.xlu1 %v1728_v41  ;;  %1667 = vset.pattern.permute.xlu0 %v1729_v43 }
  0x20   :  { %309 = vperm.xlu1 %1661, %v1773_v2   ;;  %1489 = vmatpush3.bf16.msra.mxu1 %v1926_v37 }
  0x21   :  { %1490 = vmatprep.subr.bf16.mxu1 %v1940_v39  ;;  %1469 = vmatpush3.bf16.msra.mxu0 %v1945_v40 }
  0x22   :  { %1470 = vmatprep.subr.bf16.mxu0 %v1957_v44 }
  0x24   :  { %1663 = vset.pattern.permute.xlu1 %v1730_v48  ;;  %1491 = vmatpush3.bf16.msra.mxu1 %v1950_v42 }
  0x25   :  { %363 = vperm.xlu1 %1663, %v1773_v2   ;;  %1492 = vmatprep.subr.bf16.mxu1 %v1964_v45 }
  0x26   :  { %1471 = vmatpush3.bf16.msra.mxu0 %v1970_v46 }
  0x27   :  { %1500 = vmatprep.subr.bf16.mxu0 %v1981_v49 }
  0x28   :  { %1493 = vmatpush3.bf16.msra.mxu1 %v1975_v47 }
  0x29   :  { %1664 = vset.pattern.permute.xlu1 %v1731_v50  ;;  %1522 = vmatprep.subr.bf16.mxu1 %v1778_v3 }
  0x2a   :  { %390 = vperm.xlu1 %1664, %v1773_v2  }
  0x2e   :  { %1666 = vset.pattern.permute.xlu1 %v1729_v43 }
  0x2f   :  { %444 = vperm.xlu1 %1666, %v1773_v2  }
  0x81   :  { %v2001_v55 = vpop.permute.xlu1 %87  ;;  %v34_v56 = vpop.permute.xlu0 %33 }
  0x82   :  { %vm89_vm1 = vcmp.eq.s32.totalorder %v1993_v52, %v2001_v55  ;;  %vm91_vm2 = vcmp.eq.s32.totalorder %v1996_v53, %v2001_v55  ;;  %vm94_vm3 = vcmp.eq.s32.totalorder %v1999_v54, %v2001_v55  ;;  %vm90_vm4 = vcmp.eq.s32.totalorder %v2004_v57, %v2001_v55 }
  0x83   :  { %v2025_v63 = vsel %vm89_vm1, 1.0, %v1732_v62  ;;  %vm35_vm5 = vcmp.eq.s32.totalorder %v1993_v52, %v34_v56  ;;  %vm36_vm6 = vcmp.eq.s32.totalorder %v2004_v57, %v34_v56  ;;  %vm92_vm7 = vcmp.eq.s32.totalorder %v2007_v58, %v2001_v55 }
  0x84   :  { %v2032_v0 = vsel %vm91_vm2, 1.0, %v1732_v62  ;;  %v2035_v1 = vsel %vm94_vm3, 1.0, %v1732_v62  ;;  %vm37_vm8 = vcmp.eq.s32.totalorder %v1996_v53, %v34_v56  ;;  %vm38_vm9 = vcmp.eq.s32.totalorder %v2007_v58, %v34_v56 }
  0x85   :  { %vm39_vm10 = vcmp.eq.s32.totalorder %v2016_v59, %v34_v56  ;;  %vm40_vm11 = vcmp.eq.s32.totalorder %v1999_v54, %v34_v56  ;;  %v1307_v2 = vsel %vm35_vm5, 1.0, %v1732_v62  ;;  %v1308_v3 = vsel %vm36_vm6, 1.0, %v1732_v62 }
  0x86   :  { %v2018_v60 = vpop.permute.xlu1 %114  ;;  %v2020_v61 = vpop.permute.xlu0 %60  ;;  %v1309_v13 = vsel %vm37_vm8, 1.0, %v1732_v62  ;;  %v1310_v21 = vsel %vm38_vm9, 1.0, %v1732_v62  ;;  %v2071_v27 = vsel %vm39_vm10, 1.0, %v1732_v62  ;;  %v1312_v28 = vsel %vm40_vm11, 1.0, %v1732_v62 }
  0x87   :  { %vm62_vm12 = vcmp.eq.s32.totalorder %v1993_v52, %v2020_v61  ;;  %vm63_vm13 = vcmp.eq.s32.totalorder %v2004_v57, %v2020_v61  ;;  %vm116_vm14 = vcmp.eq.s32.totalorder %v1993_v52, %v2018_v60  ;;  %vm64_vm15 = vcmp.eq.s32.totalorder %v1996_v53, %v2020_v61 }
  0x88   :  { %vm118_vm0 = vcmp.eq.s32.totalorder %v1996_v53, %v2018_v60  ;;  %vm121_vm1 = vcmp.eq.s32.totalorder %v1999_v54, %v2018_v60  ;;  %vm67_vm2 = vcmp.eq.s32.totalorder %v1999_v54, %v2020_v61  ;;  %v1314_v6 = vsel %vm63_vm13, 1.0, %v1732_v62 }
  0x89   :  { %vm65_vm3 = vcmp.eq.s32.totalorder %v2007_v58, %v2020_v61  ;;  %v1313_v14 = vsel %vm62_vm12, 1.0, %v1732_v62  ;;  %v1315_v20 = vsel %vm64_vm15, 1.0, %v1732_v62  ;;  %v1325_v34 = vsel %vm116_vm14, 1.0, %v1732_v62 }
  0x8a   :  { %v2080_v41 = vsel %vm118_vm0, 1.0, %v1732_v62  ;;  %v2083_v43 = vsel %vm121_vm1, 1.0, %v1732_v62  ;;  %v1318_v48 = vsel %vm67_vm2, 1.0, %v1732_v62  ;;  %v81_v50 = vadd.f32 %v1314_v6, %v1308_v3 }
  0x8b   :  { %v2058_v7 = vpop.permute.xlu1 %141  ;;  %v2077_v35 = vpop.permute.xlu0 %168  ;;  %v1316_v51 = vsel %vm65_vm3, 1.0, %v1732_v62  ;;  %v80_v4 = vadd.f32 %v1313_v14, %v1307_v2  ;;  %v82_v47 = vadd.f32 %v1315_v20, %v1309_v13  ;;  %v1320_v56 = vsel %vm90_vm4, 1.0, %v1732_v62 }
  0x8c   :  { %v108_v42 = vadd.f32 %v1320_v56, %v81_v50  ;;  %vm117_vm5 = vcmp.eq.s32.totalorder %v2004_v57, %v2018_v60  ;;  %vm144_vm6 = vcmp.eq.s32.totalorder %v2004_v57, %v2058_v7  ;;  %vm171_vm8 = vcmp.eq.s32.totalorder %v2004_v57, %v2077_v35 }
  0x8d   :  { %v85_v3 = vadd.f32 %v1318_v48, %v1312_v28  ;;  %vm143_vm9 = vcmp.eq.s32.totalorder %v1993_v52, %v2058_v7  ;;  %v1326_v2 = vsel %vm117_vm5, 1.0, %v1732_v62  ;;  %v1332_v6 = vsel %vm144_vm6, 1.0, %v1732_v62 }
  0x8e   :  { %vm66_vm4 = vcmp.eq.s32.totalorder %v2016_v59, %v2020_v61  ;;  %vm145_vm10 = vcmp.eq.s32.totalorder %v1996_v53, %v2058_v7  ;;  %v135_v13 = vadd.f32 %v1326_v2, %v108_v42  ;;  %v83_v14 = vadd.f32 %v1316_v51, %v1310_v21 }
  0x8f   :  { %v1338_v20 = vsel %vm171_vm8, 1.0, %v1732_v62  ;;  %v1322_v48 = vsel %vm92_vm7, 1.0, %v1732_v62  ;;  %vm119_vm12 = vcmp.eq.s32.totalorder %v2007_v58, %v2018_v60  ;;  %vm146_vm13 = vcmp.eq.s32.totalorder %v2007_v58, %v2058_v7 }
  0x90   :  { %v2091_v45 = vpop.permute.xlu1 %195  ;;  %v162_v50 = vadd.f32 %v1332_v6, %v135_v13  ;;  %v110_v56 = vadd.f32 %v1322_v48, %v83_v14  ;;  %v1328_v42 = vsel %vm119_vm12, 1.0, %v1732_v62  ;;  %v1334_v51 = vsel %vm146_vm13, 1.0, %v1732_v62 }
  0x91   :  { %vm198_vm11 = vcmp.eq.s32.totalorder %v2004_v57, %v2091_v45  ;;  %vm173_vm14 = vcmp.eq.s32.totalorder %v2007_v58, %v2077_v35  ;;  %vm200_vm7 = vcmp.eq.s32.totalorder %v2007_v58, %v2091_v45  ;;  %v107_v2 = vadd.f32 %v2025_v63, %v80_v4 }
  0x92   :  { %v1344_v28 = vsel %vm198_vm11, 1.0, %v1732_v62  ;;  %vm148_vm15 = vcmp.eq.s32.totalorder %v1999_v54, %v2058_v7  ;;  %v189_v6 = vadd.f32 %v1338_v20, %v162_v50  ;;  %v137_v13 = vadd.f32 %v1328_v42, %v110_v56 }
  0x93   :  { %v1340_v48 = vsel %vm173_vm14, 1.0, %v1732_v62  ;;  %v1346_v39 = vsel %vm200_vm7, 1.0, %v1732_v62  ;;  %v134_v37 = vadd.f32 %v1325_v34, %v107_v2  ;;  %v1331_v4 = vsel %vm143_vm9, 1.0, %v1732_v62 }
  0x94   :  { %v216_v33 = vadd.f32 %v1344_v28, %v189_v6  ;;  %v164_v31 = vadd.f32 %v1334_v51, %v137_v13  ;;  %vm93_vm2 = vcmp.eq.s32.totalorder %v2016_v59, %v2001_v55  ;;  %vm170_vm3 = vcmp.eq.s32.totalorder %v1993_v52, %v2077_v35  ;;  %v2221_v55 = vld [vmem:[%s2633_s1 + $0x150] sm:$0xff]  }
  0x95   :  { %v2120_v21 = vpop.permute.xlu1 %222  ;;  %v161_v63 = vadd.f32 %v1331_v4, %v134_v37  ;;  %vm197_vm5 = vcmp.eq.s32.totalorder %v1993_v52, %v2091_v45  ;;  %v1337_v28 = vsel %vm170_vm3, 1.0, %v1732_v62  ;;  %v109_v51 = vadd.f32 %v2032_v0, %v82_v47 }
  0x96   :  { %vm225_vm0 = vcmp.eq.s32.totalorder %v2004_v57, %v2120_v21  ;;  %vm227_vm1 = vcmp.eq.s32.totalorder %v2007_v58, %v2120_v21  ;;  %vm224_vm6 = vcmp.eq.s32.totalorder %v1993_v52, %v2120_v21  ;;  %v191_v20 = vadd.f32 %v1340_v48, %v164_v31 }
  0x97   :  { %v1350_v14 = vsel %vm225_vm0, 1.0, %v1732_v62  ;;  %v1343_v50 = vsel %vm197_vm5, 1.0, %v1732_v62  ;;  %v1352_v56 = vsel %vm227_vm1, 1.0, %v1732_v62  ;;  %v188_v42 = vadd.f32 %v1337_v28, %v161_v63 }
  0x98   :  { %v243_v34 = vadd.f32 %v1350_v14, %v216_v33  ;;  %v1349_v37 = vsel %vm224_vm6, 1.0, %v1732_v62  ;;  %v218_v6 = vadd.f32 %v1346_v39, %v191_v20  ;;  %v1333_v13 = vsel %vm145_vm10, 1.0, %v1732_v62  ;;  %v2183_v20 = vld [vmem:[%s2633_s1 + $0x100] sm:$0xff]  }
  0x99   :  { %vm172_vm8 = vcmp.eq.s32.totalorder %v1996_v53, %v2077_v35  ;;  %v1317_v31 = vsel %vm66_vm4, 1.0, %v1732_v62  ;;  %v215_v33 = vadd.f32 %v1343_v50, %v188_v42  ;;  %v136_v14 = vadd.f32 %v2080_v41, %v109_v51  ;;  %v2193_v42 = vld [vmem:[%s2633_s1 + $0x148] sm:$0xff]  }
  0x9a   :  { %v249_v2 = vpack.c.bf16 %v243_v34, %v243_v34  ;;  %vm199_vm9 = vcmp.eq.s32.totalorder %v1996_v53, %v2091_v45  ;;  %v245_v39 = vadd.f32 %v1352_v56, %v218_v6  ;;  %v1339_v47 = vsel %vm172_vm8, 1.0, %v1732_v62  ;;  %v2171_v48 = vpop.permute.xlu1 %282 }
  0x9b   :  { %vm226_vm10 = vcmp.eq.s32.totalorder %v1996_v53, %v2120_v21  ;;  %v112_v0 = vadd.f32 %v2035_v1, %v85_v3  ;;  %v242_v4 = vadd.f32 %v1349_v37, %v215_v33  ;;  %v163_v61 = vadd.f32 %v1333_v13, %v136_v14  ;;  %v2210_v13 = vld [vmem:[%s2633_s1 + $0x108] sm:$0xff]  }
  0x9c   :  { %899 = vmatprep.mubr.bf16.mxu0 %v249_v2  ;;  %v1336_v41 = vsel %vm148_vm15, 1.0, %v1732_v62  ;;  %vm175_vm4 = vcmp.eq.s32.totalorder %v1999_v54, %v2077_v35  ;;  %v251_v63 = vpack.c.bf16 %v245_v39, %v245_v39  ;;  %v1345_v34 = vsel %vm199_vm9, 1.0, %v1732_v62 }
  0x9d   :  { %v139_v1 = vadd.f32 %v2083_v43, %v112_v0  ;;  %vm202_vm11 = vcmp.eq.s32.totalorder %v1999_v54, %v2091_v45  ;;  %v84_v3 = vadd.f32 %v1317_v31, %v2071_v27  ;;  %v248_v28 = vpack.c.bf16 %v242_v4, %v242_v4  ;;  %v2225_v4 = vpop.permute.xlu0 %255 }
  0x9e   :  { %v190_v50 = vadd.f32 %v1339_v47, %v163_v61  ;;  %v1342_v56 = vsel %vm175_vm4, 1.0, %v1732_v62  ;;  %939 = vmatprep.mubr.bf16.mxu1 %v251_v63  ;;  %v1351_v43 = vsel %vm226_vm10, 1.0, %v1732_v62  ;;  %vm229_vm12 = vcmp.eq.s32.totalorder %v1999_v54, %v2120_v21 }
  0x9f   :  { %v166_v37 = vadd.f32 %v1336_v41, %v139_v1  ;;  %900 = vmatmul.mubr.bf16.vlgmr.msra.gmra.mrb[0].mxu0 %v248_v28  ;;  %v1348_v51 = vsel %vm202_vm11, 1.0, %v1732_v62  ;;  %v1323_v2 = vsel %vm93_vm2, 1.0, %v1732_v62  ;;  %v2212_v31 = vpop.permute.xlu1 %309  ;;  %vm120_vm13 = vcmp.eq.s32.totalorder %v2016_v59, %v2018_v60  ;;  %v2234_v41 = vld [vmem:[%s2633_s1 + $0x110] sm:$0xff]  }
  0xa0   :  { %v217_v27 = vadd.f32 %v1345_v34, %v190_v50  ;;  %1501 = vmatpush3.bf16.msra.mxu0 %v2183_v20  ;;  %v111_v33 = vadd.f32 %v1323_v2, %v84_v3  ;;  %v1354_v39 = vsel %vm229_vm12, 1.0, %v1732_v62  ;;  %vm147_vm14 = vcmp.eq.s32.totalorder %v2016_v59, %v2058_v7  ;;  %v2242_v7 = vld [vmem:[%s2633_s1 + $0x158] sm:$0xff]  }
  0xa1   :  { %v193_v6 = vadd.f32 %v1342_v56, %v166_v37  ;;  %1502 = vmatprep.subr.bf16.mxu0 %v2193_v42  ;;  %v1329_v60 = vsel %vm120_vm13, 1.0, %v1732_v62  ;;  %vm284_vm7 = vcmp.eq.s32.totalorder %v1993_v52, %v2171_v48  ;;  %vm174_vm15 = vcmp.eq.s32.totalorder %v2016_v59, %v2077_v35 }
  0xa2   :  { %v244_v14 = vadd.f32 %v1351_v43, %v217_v27  ;;  %v138_v63 = vadd.f32 %v1329_v60, %v111_v33  ;;  %v1335_v34 = vsel %vm147_vm14, 1.0, %v1732_v62  ;;  %vm257_vm0 = vcmp.eq.s32.totalorder %v1993_v52, %v2225_v4  ;;  %v2289_v27 = vpop.permute.xlu0 %336  ;;  %v2326_v33 = vld [vmem:[%s2633_s1 + $0x120] sm:$0xff]  }
  0xa3   :  { %v220_v47 = vadd.f32 %v1348_v51, %v193_v6  ;;  %vm285_vm1 = vcmp.eq.s32.totalorder %v2004_v57, %v2171_v48  ;;  %v1361_v35 = vsel %vm284_vm7, 1.0, %v1732_v62  ;;  %v1355_v28 = vsel %vm257_vm0, 1.0, %v1732_v62  ;;  %2660 = vst [vmem:[#allocation11_spill] sm:$0xff] %v2326_v33 }
  0xa4   :  { %v250_v0 = vpack.c.bf16 %v244_v14, %v244_v14  ;;  %1503 = vmatpush3.bf16.msra.mxu0 %v2210_v13  ;;  %v2248_v3 = vpop.permute.xlu1 %363  ;;  %v2256_v50 = vsel %vm174_vm15, 1.0, %v1732_v62  ;;  %vm311_vm2 = vcmp.eq.s32.totalorder %v1993_v52, %v2212_v31  ;;  %v2266_v56 = vadd.f32 %v1335_v34, %v138_v63 }
  0xa5   :  { %v247_v61 = vadd.f32 %v1354_v39, %v220_v47  ;;  %1504 = vmatprep.subr.bf16.mxu0 %v2221_v55  ;;  %vm286_vm3 = vcmp.eq.s32.totalorder %v1996_v53, %v2171_v48  ;;  %vm287_vm5 = vcmp.eq.s32.totalorder %v2007_v58, %v2171_v48  ;;  %vm258_vm6 = vcmp.eq.s32.totalorder %v2004_v57, %v2225_v4  ;;  %v2344_v47 = vld [vmem:[%s2633_s1 + $0x168] sm:$0xff]  }
  0xa6   :  { %940 = vmatmul.mubr.bf16.vlgmr.msra.gmra.mrb[0].mxu1 %v250_v0  ;;  %vm289_vm8 = vcmp.eq.s32.totalorder %v1999_v54, %v2171_v48  ;;  %v1362_v43 = vsel %vm285_vm1, 1.0, %v1732_v62  ;;  %vm312_vm9 = vcmp.eq.s32.totalorder %v2004_v57, %v2212_v31  ;;  %v302_v37 = vadd.f32 %v1361_v35, %v1355_v28  ;;  %2661 = vst [vmem:[#allocation12_spill] sm:$0xff] %v2344_v47 }
  0xa7   :  { %1523 = vmatpush3.bf16.msra.mxu1 %v1794_v8  ;;  %v253_v1 = vpack.c.bf16 %v247_v61, %v247_v61  ;;  %v2264_v8 = vld [vmem:[%s2633_s1 + $0x118] sm:$0xff]   ;;  %vm201_vm10 = vcmp.eq.s32.totalorder %v2016_v59, %v2091_v45  ;;  %vm314_vm4 = vcmp.eq.s32.totalorder %v2007_v58, %v2212_v31  ;;  %v1367_v51 = vsel %vm311_vm2, 1.0, %v1732_v62 }
  0xa8   :  { %1524 = vmatprep.subr.bf16.mxu1 %v1808_v10  ;;  %1505 = vmatpush3.bf16.msra.mxu0 %v2234_v41  ;;  %v2278_v10 = vld [vmem:[%s2633_s1 + $0x160] sm:$0xff]   ;;  %vm260_vm11 = vcmp.eq.s32.totalorder %v2007_v58, %v2225_v4  ;;  %vm262_vm12 = vcmp.eq.s32.totalorder %v1999_v54, %v2225_v4  ;;  %v1364_v2 = vsel %vm287_vm5, 1.0, %v1732_v62  ;;  %vm316_vm13 = vcmp.eq.s32.totalorder %v1999_v54, %v2212_v31 }
  0xa9   :  { %979 = vmatprep.mubr.bf16.mxu0 %v253_v1  ;;  %1506 = vmatprep.subr.bf16.mxu0 %v2242_v7  ;;  %2659 = vst [vmem:[#allocation10_spill] sm:$0xff] %v2278_v10  ;;  %v1356_v6 = vsel %vm258_vm6, 1.0, %v1732_v62  ;;  %v1366_v14 = vsel %vm289_vm8, 1.0, %v1732_v62  ;;  %v1368_v39 = vsel %vm312_vm9, 1.0, %v1732_v62  ;;  %vm259_vm14 = vcmp.eq.s32.totalorder %v1996_v53, %v2225_v4 }
  0xaa   :  { %vm338_vm7 = vcmp.eq.s32.totalorder %v1993_v52, %v2289_v27  ;;  %v1370_v0 = vsel %vm314_vm4, 1.0, %v1732_v62  ;;  %v1358_v60 = vsel %vm260_vm11, 1.0, %v1732_v62  ;;  %v1360_v61 = vsel %vm262_vm12, 1.0, %v1732_v62 }
  0xab   :  { %1525 = vmatpush3.bf16.msra.mxu1 %v1820_v12  ;;  %v2308_v12 = vsel %vm286_vm3, 1.0, %v1732_v62  ;;  %v329_v63 = vadd.f32 %v1367_v51, %v302_v37  ;;  %v2363_v34 = vsel %vm316_vm13, 1.0, %v1732_v62  ;;  %v303_v1 = vadd.f32 %v1362_v43, %v1356_v6  ;;  %v2388_v37 = vpop.permute.xlu0 %417  ;;  %v2394_v51 = vld [vmem:[%s2633_s1 + $0x170] sm:$0xff]  }
  0xac   :  { %1526 = vmatprep.subr.bf16.mxu1 %v1832_v16  ;;  %1507 = vmatpush3.bf16.msra.mxu0 %v2264_v8  ;;  %v2321_v16 = vpop.permute.xlu1 %390  ;;  %vm339_vm15 = vcmp.eq.s32.totalorder %v2004_v57, %v2289_v27  ;;  %v1373_v35 = vsel %vm338_vm7, 1.0, %v1732_v62  ;;  %v2370_v28 = vsel %vm259_vm14, 1.0, %v1732_v62  ;;  %vm365_vm0 = vcmp.eq.s32.totalorder %v1993_v52, %v2248_v3  ;;  %2663 = vst [vmem:[#allocation14_spill] sm:$0xff] %v2394_v51 }
  0xad   :  { %1508 = vmatprep.subr.bf16.mxu0 %v2278_v10  ;;  %vm341_vm1 = vcmp.eq.s32.totalorder %v2007_v58, %v2289_v27  ;;  %vm343_vm2 = vcmp.eq.s32.totalorder %v1999_v54, %v2289_v27  ;;  %v307_v43 = vadd.f32 %v1366_v14, %v1360_v61  ;;  %vm366_vm3 = vcmp.eq.s32.totalorder %v2004_v57, %v2248_v3 }
  0xae   :  { %vm368_vm5 = vcmp.eq.s32.totalorder %v2007_v58, %v2248_v3  ;;  %vm370_vm6 = vcmp.eq.s32.totalorder %v1999_v54, %v2248_v3  ;;  %v356_v6 = vadd.f32 %v1373_v35, %v329_v63  ;;  %vm392_vm8 = vcmp.eq.s32.totalorder %v1993_v52, %v2321_v16  ;;  %v2426_v35 = vld [vmem:[%s2633_s1 + $0x130] sm:$0xff]  }
  0xaf   :  { %1527 = vmatpush3.bf16.msra.mxu1 %v1846_v18  ;;  %v2382_v18 = vld [vmem:[%s2633_s1 + $0x128] sm:$0xff]   ;;  %v1376_v61 = vsel %vm341_vm1, 1.0, %v1732_v62  ;;  %v330_v63 = vadd.f32 %v1368_v39, %v303_v1  ;;  %vm419_vm9 = vcmp.eq.s32.totalorder %v1993_v52, %v2388_v37  ;;  %vm393_vm4 = vcmp.eq.s32.totalorder %v2004_v57, %v2321_v16 }
  0xb0   :  { %1528 = vmatprep.subr.bf16.mxu1 %v1857_v22  ;;  %1509 = vmatpush3.bf16.msra.mxu0 %v2326_v33  ;;  %2662 = vst [vmem:[#allocation13_spill] sm:$0xff] %v2382_v18  ;;  %v305_v22 = vadd.f32 %v1364_v2, %v1358_v60  ;;  %v1374_v2 = vsel %vm339_vm15, 1.0, %v1732_v62  ;;  %v2405_v14 = vpop.permute.xlu1 %444  ;;  %v1379_v60 = vsel %vm365_vm0, 1.0, %v1732_v62  ;;  %vm420_vm11 = vcmp.eq.s32.totalorder %v2004_v57, %v2388_v37 }
  0xb1   :  { %1510 = vmatprep.subr.bf16.mxu0 %v2344_v47  ;;  %v1380_v47 = vsel %vm366_vm3, 1.0, %v1732_v62  ;;  %v357_v39 = vadd.f32 %v1374_v2, %v330_v63  ;;  %v1386_v1 = vsel %vm393_vm4, 1.0, %v1732_v62  ;;  %vm447_vm12 = vcmp.eq.s32.totalorder %v2004_v57, %v2405_v14 }
  0xb2   :  { %v192_v33 = vadd.f32 %v2256_v50, %v2266_v56  ;;  %v1347_v2 = vsel %vm201_vm10, 1.0, %v1732_v62  ;;  %vm228_vm13 = vcmp.eq.s32.totalorder %v2016_v59, %v2120_v21  ;;  %v383_v63 = vadd.f32 %v1379_v60, %v356_v6  ;;  %v2468_v21 = vld [vmem:[%s2633_s1 + $0x138] sm:$0xff]  }
  0xb3   :  { %1529 = vmatpush3.bf16.msra.mxu1 %v1871_v24  ;;  %v1378_v24 = vsel %vm343_vm2, 1.0, %v1732_v62  ;;  %vm313_vm14 = vcmp.eq.s32.totalorder %v1996_v53, %v2212_v31  ;;  %v1353_v10 = vsel %vm228_vm13, 1.0, %v1732_v62  ;;  %v1391_v45 = vsel %vm419_vm9, 1.0, %v1732_v62 }
  0xb4   :  { %1530 = vmatprep.subr.bf16.mxu1 %v1883_v26  ;;  %1511 = vmatpush3.bf16.msra.mxu0 %v2382_v18  ;;  %v1385_v26 = vsel %vm392_vm8, 1.0, %v1732_v62  ;;  %v2444_v18 = vld [vmem:[%s2633_s1 + $0x178] sm:$0xff]   ;;  %v219_v50 = vadd.f32 %v1347_v2, %v192_v33  ;;  %vm446_vm10 = vcmp.eq.s32.totalorder %v1993_v52, %v2405_v14  ;;  %v1382_v6 = vsel %vm368_vm5, 1.0, %v1732_v62 }
  0xb5   :  { %1512 = vmatprep.subr.bf16.mxu0 %v2394_v51  ;;  %v384_v51 = vadd.f32 %v1380_v47, %v357_v39  ;;  %v410_v56 = vadd.f32 %v1385_v26, %v383_v63  ;;  %vm395_vm7 = vcmp.eq.s32.totalorder %v2007_v58, %v2321_v16  ;;  %vm422_vm15 = vcmp.eq.s32.totalorder %v2007_v58, %v2388_v37 }
  0xb6   :  { %v1398_v33 = vsel %vm447_vm12, 1.0, %v1732_v62  ;;  %v1397_v26 = vsel %vm446_vm10, 1.0, %v1732_v62  ;;  %v1388_v39 = vsel %vm395_vm7, 1.0, %v1732_v62  ;;  %v1394_v63 = vsel %vm422_vm15, 1.0, %v1732_v62 }
  0xb7   :  { %1531 = vmatpush3.bf16.msra.mxu1 %v1895_v30  ;;  %v1392_v30 = vsel %vm420_vm11, 1.0, %v1732_v62  ;;  %v411_v47 = vadd.f32 %v1386_v1, %v384_v51  ;;  %v334_v1 = vadd.f32 %v2363_v34, %v307_v43  ;;  %vm449_vm0 = vcmp.eq.s32.totalorder %v2007_v58, %v2405_v14 }
  0xb8   :  { %1532 = vmatprep.subr.bf16.mxu1 %v1909_v32  ;;  %1513 = vmatpush3.bf16.msra.mxu0 %v2426_v35  ;;  %v332_v32 = vadd.f32 %v1370_v0, %v305_v22  ;;  %v246_v0 = vadd.f32 %v1353_v10, %v219_v50  ;;  %v437_v22 = vadd.f32 %v1391_v45, %v410_v56  ;;  %v1384_v10 = vsel %vm370_vm6, 1.0, %v1732_v62 }
  0xb9   :  { %1514 = vmatprep.subr.bf16.mxu0 %v2444_v18  ;;  %v438_v60 = vadd.f32 %v1392_v30, %v411_v47  ;;  %vm397_vm1 = vcmp.eq.s32.totalorder %v1999_v54, %v2321_v16  ;;  %vm424_vm2 = vcmp.eq.s32.totalorder %v1999_v54, %v2388_v37  ;;  %vm451_vm3 = vcmp.eq.s32.totalorder %v1999_v54, %v2405_v14 }
  0xba   :  { %v359_v51 = vadd.f32 %v1376_v61, %v332_v32  ;;  %v464_v34 = vadd.f32 %v1397_v26, %v437_v22  ;;  %v1390_v61 = vsel %vm397_vm1, 1.0, %v1732_v62  ;;  %vm288_vm5 = vcmp.eq.s32.totalorder %v2016_v59, %v2171_v48  ;;  %v2669_v22 = vld [vmem:[#allocation11_spill] sm:$0xff] }
  0xbb   :  { %1533 = vmatpush3.bf16.msra.mxu1 %v1919_v36  ;;  %v252_v36 = vpack.c.bf16 %v246_v0, %v246_v0  ;;  %v465_v57 = vadd.f32 %v1398_v33, %v438_v60  ;;  %v1396_v30 = vsel %vm424_vm2, 1.0, %v1732_v62  ;;  %vm261_vm6 = vcmp.eq.s32.totalorder %v2016_v59, %v2225_v4  ;;  %v2667_v33 = vld [vmem:[#allocation5_spill] sm:$0xff]  ;;  %v2671_v26 = vld [vmem:[#allocation7_spill] sm:$0xff] }
  0xbc   :  { %1534 = vmatprep.subr.bf16.mxu1 %v1933_v38  ;;  %1515 = vmatpush3.bf16.msra.mxu0 %v2468_v21  ;;  %v386_v2 = vadd.f32 %v1382_v6, %v359_v51  ;;  %v361_v38 = vadd.f32 %v1378_v24, %v334_v1  ;;  %v1369_v54 = vsel %vm313_vm14, 1.0, %v1732_v62  ;;  %v1402_v50 = vsel %vm451_vm3, 1.0, %v1732_v62  ;;  %v2670_v51 = vld [vmem:[#allocation12_spill] sm:$0xff] }
  0xbd   :  { %1544 = vmatprep.subr.bf16.mxu0 %v1789_v5  ;;  %v471_v58 = vpack.c.bf16 %v465_v57, %v465_v57  ;;  %v1400_v5 = vsel %vm449_vm0, 1.0, %v1732_v62  ;;  %vm340_vm8 = vcmp.eq.s32.totalorder %v1996_v53, %v2289_v27  ;;  %v470_v4 = vpack.c.bf16 %v464_v34, %v464_v34 }
  0xbe   :  { %v413_v43 = vadd.f32 %v1388_v39, %v386_v2  ;;  %v388_v24 = vadd.f32 %v1384_v10, %v361_v38  ;;  %vm315_vm9 = vcmp.eq.s32.totalorder %v2016_v59, %v2212_v31  ;;  %vm367_vm4 = vcmp.eq.s32.totalorder %v1996_v53, %v2248_v3  ;;  %v2672_v39 = vld [vmem:[#allocation8_spill] sm:$0xff] }
  0xbf   :  { %1535 = vmatpush3.bf16.msra.mxu1 %v1945_v40  ;;  %980 = vmatmul.mubr.bf16.vlgmr.msra.gmra.mrb[4].mxu0 %v252_v36  ;;  %vm342_vm11 = vcmp.eq.s32.totalorder %v2016_v59, %v2289_v27  ;;  %vm394_vm12 = vcmp.eq.s32.totalorder %v1996_v53, %v2321_v16  ;;  %vm369_vm13 = vcmp.eq.s32.totalorder %v2016_v59, %v2248_v3  ;;  %v2664_v27 = vld [vmem:[#allocation3_spill] sm:$0xff]  ;;  %v2666_v3 = vld [vmem:[#allocation10_spill] sm:$0xff]  ;;  %vm1734_vm1 = vmmov 0  }
  0xc0   :  { %1536 = vmatprep.subr.bf16.mxu1 %v1957_v44  ;;  %1545 = vmatpush3.bf16.msra.mxu0 %v1801_v9  ;;  %v440_v40 = vadd.f32 %v1394_v63, %v413_v43  ;;  %v304_v44 = vadd.f32 %v2308_v12, %v2370_v28  ;;  %v415_v45 = vadd.f32 %v1390_v61, %v388_v24  ;;  %v1359_v28 = vsel %vm261_vm6, 1.0, %v1732_v62  ;;  %v2674_v36 = vld [vmem:[#allocation14_spill] sm:$0xff]  ;;  %v2675_v63 = vld [vmem:[#allocation9_spill] sm:$0xff]  ;;  %v1112_v43 = vld [vmem:[%s2634_s3 + $0x8] sm:$0xff] }
  0xc1   :  { %1021 = vmatprep.mubr.bf16.mxu1 %v471_v58  ;;  %1546 = vmatprep.subr.bf16.mxu0 %v1814_v11  ;;  %v1365_v11 = vsel %vm288_vm5, 1.0, %v1732_v62  ;;  %vm421_vm14 = vcmp.eq.s32.totalorder %v1996_v53, %v2388_v37  ;;  %vm396_vm10 = vcmp.eq.s32.totalorder %v2016_v59, %v2321_v16  ;;  %vm448_vm7 = vcmp.eq.s32.totalorder %v1996_v53, %v2405_v14  ;;  %v2668_v16 = vld [vmem:[#allocation6_spill] sm:$0xff] }
  0xc2   :  { %v467_v9 = vadd.f32 %v1400_v5, %v440_v40  ;;  %v442_v12 = vadd.f32 %v1396_v30, %v415_v45  ;;  %v306_v48 = vadd.f32 %v1365_v11, %v1359_v28  ;;  %v1389_v6 = vsel %vm396_vm10, 1.0, %v1732_v62  ;;  %v2676_v58 = vld [vmem:[#allocation2_spill] sm:$0xff]  ;;  %v1116_v40 = vld [vmem:[%s2635_s4 + $0x8] sm:$0xff] }
  0xc3   :  { %1537 = vmatpush3.bf16.msra.mxu1 %v1970_v46  ;;  %v331_v46 = vadd.f32 %v1369_v54, %v304_v44  ;;  %vm423_vm15 = vcmp.eq.s32.totalorder %v2016_v59, %v2388_v37  ;;  %vm450_vm0 = vcmp.eq.s32.totalorder %v2016_v59, %v2405_v14  ;;  %v2673_v37 = vld [vmem:[#allocation13_spill] sm:$0xff]  ;;  %v1733_v59 = vmov 0.0|0.0   ;;  %v1111_v14 = vld [vmem:[%s2634_s3] sm:$0xff] }
  0xc4   :  { %1566 = vmatprep.subr.bf16.mxu1 %v1981_v49  ;;  %v473_v56 = vpack.c.bf16 %v467_v9, %v467_v9  ;;  %1547 = vmatpush3.bf16.msra.mxu0 %v1825_v15  ;;  %v469_v32 = vadd.f32 %v1402_v50, %v442_v12  ;;  %v1375_v49 = vsel %vm340_vm8, 1.0, %v1732_v62  ;;  %v1371_v15 = vsel %vm315_vm9, 1.0, %v1732_v62  ;;  %v1115_v24 = vld [vmem:[%s2635_s4] sm:$0xff]  ;;  %v1118_v44 = vld [vmem:[%s2635_s4 + $0x18] sm:$0xff] }
  0xc5   :  { %1548 = vmatprep.subr.bf16.mxu0 %v1839_v17  ;;  %v358_v17 = vadd.f32 %v1375_v49, %v331_v46  ;;  %v333_v31 = vadd.f32 %v1371_v15, %v306_v48  ;;  %v1395_v53 = vsel %vm423_vm15, 1.0, %v1732_v62  ;;  %v1401_v57 = vsel %vm450_vm0, 1.0, %v1732_v62  ;;  %v1403_v46 = vld [vmem:[%s2636_s2] ss:$0 sm:$0xff] }
  0xc6   :  { %1022 = vmatmul.mubr.bf16.vlgmr.msra.gmra.mrb[4].mxu1 %v470_v4  ;;  %1061 = vmatprep.mubr.bf16.mxu0 %v473_v56  ;;  %v475_v47 = vpack.c.bf16 %v469_v32, %v469_v32  ;;  %vm1276_vm2 = vcmask 64512   ;;  %v1621_v30 = vpack.c.bf16 %v1116_v40, %v1115_v24  ;;  %vm1119_vm3 = vcmask 261120   ;;  %v1454_v24 = vld [vmem:[%s2637_s5] ss:$0 sm:$0xff] }
  0xc7   :  { %1567 = vmatpush3.bf16.msra.mxu1 %v2183_v20  ;;  %v1381_v20 = vsel %vm367_vm4, 1.0, %v1732_v62  ;;  %v1277_v5 = vsel %vm1276_vm2, %v2676_v58, 0  ;;  %vm1301_vm9 = vcmask 7168  }
  0xc8   :  { %1568 = vmatprep.subr.bf16.mxu1 %v2193_v42  ;;  %1549 = vmatpush3.bf16.msra.mxu0 %v1852_v19  ;;  %v1377_v42 = vsel %vm342_vm11, 1.0, %v1732_v62  ;;  %v385_v19 = vadd.f32 %v1381_v20, %v358_v17  ;;  %v1279_v45 = vshrl.u32 %v1277_v5, 16  ;;  %v1278_v54 = vand.u32 65535, %v1277_v5 }
  0xc9   :  { %1101 = vmatprep.mubr.bf16.mxu1 %v475_v47  ;;  %1550 = vmatprep.subr.bf16.mxu0 %v1864_v23  ;;  %v1387_v23 = vsel %vm394_vm12, 1.0, %v1732_v62 }
  0xca   :  { %v1281_v50 = vcvt.s32.f32 %v1279_v45  ;;  %v1280_v4 = vcvt.s32.f32 %v1278_v54 }
  0xcb   :  { %1569 = vmatpush3.bf16.msra.mxu1 %v2210_v13  ;;  %v360_v13 = vadd.f32 %v1377_v42, %v333_v31 }
  0xcc   :  { %1570 = vmatprep.subr.bf16.mxu1 %v2221_v55  ;;  %1551 = vmatpush3.bf16.msra.mxu0 %v1878_v25  ;;  %v1383_v55 = vsel %vm369_vm13, 1.0, %v1732_v62  ;;  %v2665_v25 = vld [vmem:[#allocation4_spill] sm:$0xff] }
  0xcd   :  { %1552 = vmatprep.subr.bf16.mxu0 %v1888_v29  ;;  %v412_v29 = vadd.f32 %v1387_v23, %v385_v19  ;;  %1284 = vadd.xlane.f32.xlu1 %v1281_v50 }
  0xce   :  { %1282 = vadd.xlane.f32.xlu0 %v1280_v4 }
  0xcf   :  { %1571 = vmatpush3.bf16.msra.mxu1 %v2234_v41  ;;  %v1393_v41 = vsel %vm421_vm14, 1.0, %v1732_v62 }
  0xd0   :  { %1572 = vmatprep.subr.bf16.mxu1 %v2242_v7  ;;  %1553 = vmatpush3.bf16.msra.mxu0 %v2664_v27  ;;  %v387_v7 = vadd.f32 %v1383_v55, %v360_v13  ;;  %v439_v0 = vadd.f32 %v1393_v41, %v412_v29 }
  0xd1   :  { %1554 = vmatprep.subr.bf16.mxu0 %v2665_v25 }
  0xd2   :  { %v414_v60 = vadd.f32 %v1389_v6, %v387_v7 }
  0xd3   :  { %1573 = vmatpush3.bf16.msra.mxu1 %v2264_v8  ;;  %v1399_v8 = vsel %vm448_vm7, 1.0, %v1732_v62 }
  0xd4   :  { %1574 = vmatprep.subr.bf16.mxu1 %v2666_v3  ;;  %1555 = vmatpush3.bf16.msra.mxu0 %v2667_v33  ;;  %v466_v1 = vadd.f32 %v1399_v8, %v439_v0  ;;  %v441_v2 = vadd.f32 %v1395_v53, %v414_v60 }
  0xd5   :  { %1556 = vmatprep.subr.bf16.mxu0 %v2668_v16 }
  0xd6   :  { %v472_v38 = vpack.c.bf16 %v466_v1, %v466_v1  ;;  %v468_v10 = vadd.f32 %v1401_v57, %v441_v2 }
  0xd7   :  { %1575 = vmatpush3.bf16.msra.mxu1 %v2669_v22 }
  0xd8   :  { %1576 = vmatprep.subr.bf16.mxu1 %v2670_v51  ;;  %1557 = vmatpush3.bf16.msra.mxu0 %v2671_v26  ;;  %v474_v34 = vpack.c.bf16 %v468_v10, %v468_v10 }
  0xd9   :  { %1558 = vmatprep.subr.bf16.mxu0 %v2672_v39 }
  0xdb   :  { %1577 = vmatpush3.bf16.msra.mxu1 %v2673_v37 }
  0xdc   :  { %1578 = vmatprep.subr.bf16.mxu1 %v2674_v36  ;;  %1559 = vmatpush3.bf16.msra.mxu0 %v2675_v63 }
  0xdd   :  { %1620 = vmatprep.subr.bf16.mxu0 %v1733_v59 }
  0xdf   :  { %1579 = vmatpush3.bf16.msra.mxu1 %v2426_v35  ;;  %1062 = vmatmul.mubr.bf16.vlgmr.msra.gmra.mrb[8].mxu0 %v472_v38  ;;  %v1627_v35 = vpack.c.bf16 %v1112_v43, %v1111_v14 }
  0xe0   :  { %1580 = vmatprep.subr.bf16.mxu1 %v2444_v18  ;;  %v1113_v18 = vld [vmem:[%s2634_s3 + $0x10] sm:$0xff]  ;;  %1606 = vmatprep.mubr.msk.f32.mxu0 %vm1734_vm1, %v1732_v62 }
  0xe1   :  { %1622 = vmatpush3.bf16.msra.mxu0 %v1621_v30 }
  0xe2   :  { %1623 = vmatprep.subr.bf16.mxu0 %v1733_v59 }
  0xe3   :  { %1581 = vmatpush3.bf16.msra.mxu1 %v2468_v21  ;;  %v1114_v21 = vld [vmem:[%s2634_s3 + $0x18] sm:$0xff] }
  0xe4   :  { %1626 = vmatprep.subr.bf16.mxu1 %v1733_v59  ;;  %v1630_v61 = vpack.c.bf16 %v1114_v21, %v1113_v18 }
  0xe6   :  { %1102 = vmatmul.mubr.bf16.vlgmr.msra.gmra.mrb[8].mxu1 %v474_v34 }
  0xe7   :  { %1617 = vmatprep.mubr.msk.f32.mxu1 %vm1734_vm1, %v1732_v62  ;;  %1628 = vmatpush3.bf16.msra.mxu1 %v1627_v35  ;;  %v1117_v62 = vld [vmem:[%s2635_s4 + $0x10] sm:$0xff] }
  0xe8   :  { %1629 = vmatprep.subr.bf16.mxu1 %v1733_v59  ;;  %v1624_v9 = vpack.c.bf16 %v1118_v44, %v1117_v62 }
  0xea   :  { %1625 = vmatpush3.bf16.msra.mxu0 %v1624_v9 }
  0xeb   :  { %1631 = vmatpush3.bf16.msra.mxu1 %v1630_v61 }
 0x15a   :  { %v1285_v34 = vpop.xlane.xlu1 %1284 }
 0x15b   :  { %v1287_v59 = vcvt.f32.s32 %v1285_v34  ;;  %v1283_v14 = vpop.xlane.xlu0 %1282 }
 0x15c   :  { %v1286_v18 = vcvt.f32.s32 %v1283_v14 }
 0x15d   :  { %v1288_v43 = vshll.u32 %v1287_v59, 16 }
 0x15f   :  { %v1289_v35 = vadd.s32 %v1288_v43, %v1286_v18 }
 0x161   :  { %v1455_v21 = vadd.s32 4294967295, %v1289_v35 }
 0x163   :  { %v1291_v61 = vshra.s32 %v1455_v21, 2 }
 0x165   :  { %vm1292_vm5 = vcmp.gt.s32.totalorder %v1291_v61, 0 }
 0x166   :  { %v1293_v58 = vsel %vm1292_vm5, %v1291_v61, 0 }
 0x167   :  { %vm1294_vm6 = vcmp.lt.s32.totalorder %v1293_v58, 7 }
 0x168   :  { %v1295_v30 = vsel %vm1294_vm6, %v1293_v58, 7 }
 0x169   :  { %vm1296_vm8 = vcmp.eq.s32.totalorder %v1993_v52, %v1295_v30 }
 0x172   :  { %v1472_v12 = vpop.f32.mrb[0].mxu0 }
 0x173   :  { %v1473_v11 = vpop.f32.mrb[1].mxu0 }
 0x174   :  { %v1474_v28 = vadd.f32 %v1473_v11, %v1472_v12  ;;  %v1475_v56 = vpop.f32.mrb[2].mxu0 }
 0x175   :  { %v1476_v32 = vpop.f32.mrb[3].mxu0 }
 0x176   :  { %v902_v48 = vadd.f32 %v1474_v28, %v1403_v46 }
 0x179   :  { %v1494_v49 = vpop.f32.mrb[0].mxu1 }
 0x17a   :  { %v1495_v47 = vpop.f32.mrb[1].mxu1 }
 0x17b   :  { %v1496_v15 = vadd.f32 %v1495_v47, %v1494_v49  ;;  %v1497_v17 = vpop.f32.mrb[2].mxu1 }
 0x17c   :  { %v1498_v20 = vpop.f32.mrb[3].mxu1 }
 0x17d   :  { %v942_v31 = vadd.f32 %v1496_v15, %v902_v48 }
 0x192   :  { %v1516_v42 = vpop.f32.mrb[4].mxu0 }
 0x193   :  { %v1517_v19 = vpop.f32.mrb[5].mxu0 }
 0x194   :  { %v1518_v23 = vadd.f32 %v1517_v19, %v1516_v42  ;;  %v1519_v13 = vpop.f32.mrb[6].mxu0 }
 0x195   :  { %v1520_v55 = vpop.f32.mrb[7].mxu0 }
 0x196   :  { %v982_v27 = vadd.f32 %v1518_v23, %v942_v31 }
 0x198   :  { %v987_v29 = vmax.f32 %v982_v27, 0.0 }
 0x199   :  { %v1538_v25 = vpop.f32.mrb[4].mxu1 }
 0x19a   :  { %v1539_v41 = vpop.f32.mrb[5].mxu1  ;;  %v988_v3 = vmin.f32 %v987_v29, 1.0 }
 0x19b   :  { %v1540_v7 = vadd.f32 %v1539_v41, %v1538_v25  ;;  %v1541_v6 = vpop.f32.mrb[6].mxu1 }
 0x19c   :  { %v1542_v33 = vpop.f32.mrb[7].mxu1  ;;  %1618 = vmatmul.mubr.msk.f32.vlgmr.msra.gmra.mrb[12].mxu1 %vm1119_vm3, %v988_v3 }
 0x19d   :  { %v1024_v22 = vadd.f32 %v1540_v7, %v1403_v46 }
 0x1b2   :  { %v1560_v16 = vpop.f32.mrb[8].mxu0 }
 0x1b3   :  { %v1561_v0 = vpop.f32.mrb[9].mxu0 }
 0x1b4   :  { %v1562_v8 = vadd.f32 %v1561_v0, %v1560_v16  ;;  %v1563_v51 = vpop.f32.mrb[10].mxu0 }
 0x1b5   :  { %v1564_v60 = vpop.f32.mrb[11].mxu0 }
 0x1b6   :  { %v1064_v26 = vadd.f32 %v1562_v8, %v1024_v22 }
 0x1b9   :  { %v1582_v53 = vpop.f32.mrb[8].mxu1 }
 0x1ba   :  { %v1583_v39 = vpop.f32.mrb[9].mxu1 }
 0x1bb   :  { %v1584_v1 = vadd.f32 %v1583_v39, %v1582_v53  ;;  %v1585_v37 = vpop.f32.mrb[10].mxu1 }
 0x1bc   :  { %v1586_v36 = vpop.f32.mrb[11].mxu1 }
 0x1bd   :  { %v1104_v2 = vadd.f32 %v1584_v1, %v1064_v26 }
 0x1bf   :  { %v1109_v63 = vmax.f32 %v1104_v2, 0.0 }
 0x1c1   :  { %v1110_v57 = vmin.f32 %v1109_v63, 1.0 }
 0x1c3   :  { %1607 = vmatmul.mubr.msk.f32.vlgmr.msra.gmra.mrb[12].mxu0 %vm1119_vm3, %v1110_v57 }
 0x26f   :  { %v1262_v38 = vpop.f32.mrb[12].mxu1 }
 0x270   :  { %v1619_v10 = vpop.f32.mrb[13].mxu1 }
 0x296   :  { %v1189_v5 = vpop.f32.mrb[12].mxu0 }
 0x297   :  { %v1263_v40 = vadd.f32 %v1262_v38, %v1189_v5  ;;  %v1608_v62 = vpop.f32.mrb[13].mxu0 }
 0x299   :  { %v1273_v44 = vadd.f32 %v1454_v24, %v1263_v40 }
 0x29b   :  { %v1297_v45 = vsel %vm1296_vm8, %v1273_v44, 0.0 }
 0x29c   :  { %v1298_v54 = vsel %vm1276_vm2, %v1297_v45, 0.0 }
 0x29d   :  { %1299 = vadd.xlane.f32.xlu0 %v1298_v54 }
 0x32a   :  { %v1300_v9 = vpop.xlane.xlu0 %1299 }
 0x32b   :  { %1302 = vst.msk [vmem:[%s2638_s6] sm:$0xff] %vm1301_vm9, %v1300_v9 }

</bundles_post_ra>
